<compile_context>
chip_gen: v7x
topology: tpu7x:2x2x1
jax: 0.10.0
libtpu: 0.0.40
codegen_flags: <defaults>
</compile_context>

<pallas_src>
import functools

import jax
import jax.numpy as jnp
from jax import lax
from jax.experimental import pallas as pl
from jax.experimental.pallas import tpu as pltpu


# ---------------------------------------------------------------------------
# One-time probe: does pltpu.roll follow jnp.roll semantics
# (dst[i] = src[i - shift])?  Keeps the row-shift direction provably correct.
# ---------------------------------------------------------------------------
_ROLL_LIKE_JNP = None


def _roll_like_jnp_roll() -> bool:
    global _ROLL_LIKE_JNP
    if _ROLL_LIKE_JNP is None:
        def probe(x_ref, o_ref):
            o_ref[...] = pltpu.roll(x_ref[...], shift=1, axis=0)

        x = jnp.tile(jnp.arange(8, dtype=jnp.float32)[:, None], (1, 128))
        y = pl.pallas_call(
            probe, out_shape=jax.ShapeDtypeStruct((8, 128), jnp.float32))(x)
        _ROLL_LIKE_JNP = bool(float(y[1, 0]) == 0.0)
    return _ROLL_LIKE_JNP


# ---------------------------------------------------------------------------
# Generation-aware VMEM budget + batch-block selection.
# ---------------------------------------------------------------------------
def _vmem_budget_bytes():
    cap = 64 * 1024 * 1024  # conservative default (v7x physical per-TC VMEM)
    try:
        cap = int(pltpu.get_tpu_info().vmem_capacity_bytes)
    except Exception:
        pass
    # ~75% of physical, capped at 96 MiB: ~48 MiB on v7x (64 MiB physical),
    # ~96 MiB on v5e/v6e (128 MiB physical).  Planning budget == vmem limit.
    return max(16 * 1024 * 1024, min(3 * cap // 4, 96 * 1024 * 1024))


def _pick_block_b(B, T, H, W, Cin, Cout, budget):
    """Pick how many batch samples (all T steps each) live in one grid step."""
    bpe = 4  # f32 compute path
    in_tile = bpe * T * H * W * Cin           # input block, per sample
    out_tile = bpe * T * H * W * Cout         # spike output block, per sample
    acc = bpe * T * H * W * Cout              # f32 conv accumulator (live)
    shifted = 2 * in_tile                     # two rolled input copies
    mem_state = bpe * H * W * Cout            # LIF membrane
    # in/out are double-buffered by the BlockSpec pipeline; the rest is live
    # once per grid step.
    per_sample = 2 * (in_tile + out_tile) + acc + shifted + mem_state
    consts = bpe * (3 * W * Cin * W * Cout + W * Cout)  # weight + BN shift (1x)
    avail = budget - consts
    bb = max(1, min(B, avail // per_sample)) if per_sample > 0 else B
    if bb >= B and B > 1:
        bb = max(1, B // 2)  # keep >= 2 grid steps so v7x's two TCs can split
    # TODO(synk): for awkward B (e.g. prime), pad B or use a masked ragged last
    # block instead of shrinking bb toward 1.
    while B % bb:
        bb -= 1
    return int(bb)


# ---------------------------------------------------------------------------
# Banded block-Toeplitz conv operator (dx taps + W zero-padding folded in).
# A[dy, w'*Cin+ci, w*Cout+co] = w_eff[dy, w'-w+1, ci, co]  (0 if dx out of [0,3))
# ---------------------------------------------------------------------------
def _build_toeplitz_weight(w_eff, W, Cin, Cout):
    wp = jnp.arange(W)[:, None]          # input column w'
    wo = jnp.arange(W)[None, :]          # output column w
    dx = wp - wo + 1                     # (W, W)
    valid = ((dx >= 0) & (dx <= 2)).astype(w_eff.dtype)
    dxc = jnp.clip(dx, 0, 2)
    g = w_eff[:, dxc, :, :] * valid[None, :, :, None, None]  # (3,W,W,Cin,Cout)
    return jnp.transpose(g, (0, 1, 3, 2, 4)).reshape(3, W * Cin, W * Cout)


# ---------------------------------------------------------------------------
# Fused kernel: conv3x3(stride1,pad1,no-bias) + folded BN + LIF spike epilogue.
# Folded-NHWC layout: activations are (b, t, H, W*C), channels fastest on lanes.
# ---------------------------------------------------------------------------
def _conv3x3_bn_lif_kernel(x_ref, a_ref, b_ref, o_ref, *, vth, decay,
                           fuse_lif, roll_like_jnp):
    bb, T, H, WCin = x_ref.shape
    WCout = o_ref.shape[-1]
    m = bb * T * H

    # Fold (bb, T, H) into the matmul M dim.  (Layout-free when H % 8 == 0;
    # for later stages with H in {14, 7} pad H to a multiple of 8.)
    x2 = x_ref[...].reshape(m, WCin).astype(jnp.float32)

    # H zero-padding via XLU sublane rolls.  Rows that wrapped across an H /
    # sample boundary are exactly the rows that need conv zero-padding, so one
    # iota mask handles both.
    dn_shift = 1 if roll_like_jnp else m - 1      # x_dn[r] = x2[r-1]
    up_shift = m - 1 if roll_like_jnp else 1      # x_up[r] = x2[r+1]
    x_dn = pltpu.roll(x2, shift=dn_shift, axis=0)
    x_up = pltpu.roll(x2, shift=up_shift, axis=0)
    h_idx = lax.broadcasted_iota(jnp.int32, (bb * T, H, WCin), 1)
    h_idx = h_idx.reshape(m, WCin)
    x_dn = jnp.where(h_idx == 0, 0.0, x_dn)
    x_up = jnp.where(h_idx == H - 1, 0.0, x_up)

    # Three lane-dense MXU matmuls cover all 9 conv taps + W zero-padding.
    # NOTE(scaling): at real channel counts cast operands to bf16 (keep the
    # f32 accumulator) and strip-tile the Toeplitz weight over W.
    acc = jnp.dot(x_dn, a_ref[0], preferred_element_type=jnp.float32)
    acc = acc + jnp.dot(x2, a_ref[1], preferred_element_type=jnp.float32)
    acc = acc + jnp.dot(x_up, a_ref[2], preferred_element_type=jnp.float32)
    acc = acc + b_ref[...]                         # (1, WCout) BN shift bcast

    if not fuse_lif:
        o_ref[...] = acc.reshape(bb, T, H, WCout).astype(o_ref.dtype)
        return

    # Fused LIF (SpikeLayer) epilogue over the time dimension, entirely in f32
    # VMEM/vregs — no conv->spike HBM round-trip.
    acc = acc.reshape(bb, T, H, WCout)
    mem = jnp.zeros((bb, H, WCout), jnp.float32)
    for t in range(T):                             # T small & static: unrolled
        mem = mem * decay + acc[:, t]
        spike = (mem > vth).astype(jnp.float32)
        o_ref[:, t] = spike.astype(o_ref.dtype)
        mem = (1.0 - spike) * mem


def conv3x3_bn_lif_pallas(x_fold, w_eff, shift, *, H, W, Cin, Cout, vth, decay,
                          fuse_lif=True, block_b=None, out_dtype=None):
    """x_fold: (B, T, H, W*Cin) folded NHWC -> (B, T, H, W*Cout) folded NHWC.

    fuse_lif=True  -> returns LIF spikes (conv+BN+spike fused, no HBM bounce).
    fuse_lif=False -> returns the conv+BN pre-activation (used for validation).
    out_dtype: spikes are exactly {0,1}; downstream stages may pass bf16
    (v7x-safe) or int8 (v5e/v6e MXU int path) to shrink HBM traffic.
    """
    B, T = int(x_fold.shape[0]), int(x_fold.shape[1])
    out_dtype = x_fold.dtype if out_dtype is None else out_dtype

    A = _build_toeplitz_weight(w_eff, W, Cin, Cout)        # (3, W*Cin, W*Cout)
    b_lane = jnp.tile(shift, W).reshape(1, W * Cout)       # lane-tiled BN shift

    budget = _vmem_budget_bytes()
    if block_b is None:
        block_b = _pick_block_b(B, T, H, W, Cin, Cout, budget)
    grid = (B // block_b,)

    kern = functools.partial(
        _conv3x3_bn_lif_kernel, vth=float(vth), decay=float(decay),
        fuse_lif=bool(fuse_lif), roll_like_jnp=_roll_like_jnp_roll())

    def _call(single_buffer_consts):
        const_kw = (dict(pipeline_mode=pl.Buffered(1))
                    if single_buffer_consts else {})
        grid_spec = pltpu.PrefetchScalarGridSpec(
            num_scalar_prefetch=0,
            grid=grid,
            in_specs=[
                pl.BlockSpec((block_b, T, H, W * Cin),
                             lambda b: (b, 0, 0, 0)),
                # Grid-invariant blocks: stay VMEM-resident, single-buffered.
                pl.BlockSpec((3, W * Cin, W * Cout),
                             lambda b: (0, 0, 0), **const_kw),
                pl.BlockSpec((1, W * Cout), lambda b: (0, 0), **const_kw),
            ],
            out_specs=pl.BlockSpec((block_b, T, H, W * Cout),
                                   lambda b: (b, 0, 0, 0)),
        )
        return pl.pallas_call(
            kern,
            out_shape=jax.ShapeDtypeStruct((B, T, H, W * Cout), out_dtype),
            grid_spec=grid_spec,
            compiler_params=pltpu.CompilerParams(
                dimension_semantics=("parallel",),
                vmem_limit_bytes=int(budget)),
        )(x_fold, A, b_lane)

    if fuse_lif or True:  # always try single-buffered consts first
        try:
            return _call(True)
        except Exception:
            pass  # pipeline_mode / Buffered(1) unsupported -> default buffering
    return _call(False)


# ---------------------------------------------------------------------------
# First stage of TFSNN_ResNet18.forward:
#   x = ConvertToTimeMod(Conv2d(Cin,Cout,3,1,1,bias=False), BatchNorm2d)(x)
#   x = SpikeLayer(Vth, decay)(x, T)
# x_seq layout matches PyTorch: (B, T, Cin, H, W).
# ---------------------------------------------------------------------------
def tfsnn_first_stage(x_seq, w_hwio, bn_gamma, bn_beta, bn_mean, bn_var,
                      vth, decay, eps=1e-5, out_dtype=jnp.float32):
    B, T, Cin, H, W = x_seq.shape
    Cout = w_hwio.shape[-1]

    # Fold eval-mode BatchNorm into the conv: y = conv(x) * s + shift.
    s = bn_gamma / jnp.sqrt(bn_var + eps)
    shift = bn_beta - bn_mean * s
    w_eff = w_hwio * s[None, None, None, :]

    # Single NCHW -> folded-NHWC transpose at stage input.
    x_fold = jnp.transpose(x_seq, (0, 1, 3, 4, 2)).reshape(B, T, H, W * Cin)

    s_fold = conv3x3_bn_lif_pallas(
        x_fold, w_eff, shift, H=H, W=W, Cin=Cin, Cout=Cout,
        vth=vth, decay=decay, fuse_lif=True, out_dtype=out_dtype)

    # Single folded-NHWC -> NCHW transpose at stage output (PyTorch parity).
    return jnp.transpose(s_fold.reshape(B, T, H, W, Cout), (0, 1, 4, 2, 3))


if __name__ == "__main__":
    B, T, Cin, Cout, H, W = 2, 2, 4, 8, 16, 16
    Vth, decay, eps = 0.3, 0.25, 1e-5

    key = jax.random.PRNGKey(0)
    kx, kw, kg, kb, km, kv = jax.random.split(key, 6)
    x_seq = jax.random.normal(kx, (B, T, Cin, H, W), dtype=jnp.float32)
    w_hwio = jax.random.normal(kw, (3, 3, Cin, Cout), dtype=jnp.float32) * 0.3
    gamma = 1.0 + 0.1 * jax.random.normal(kg, (Cout,), dtype=jnp.float32)
    beta = 0.1 * jax.random.normal(kb, (Cout,), dtype=jnp.float32)
    mean = 0.1 * jax.random.normal(km, (Cout,), dtype=jnp.float32)
    var = jax.random.uniform(kv, (Cout,), minval=0.5, maxval=1.5,
                             dtype=jnp.float32)

    # End-to-end fused first stage (conv + BN + LIF spikes).
    y = tfsnn_first_stage(x_seq, w_hwio, gamma, beta, mean, var, Vth, decay,
                          eps=eps)
    y = jax.block_until_ready(y)
    assert y.shape == (B, T, Cout, H, W), y.shape

    # ---- staged correctness checks -------------------------------------
    s_bn = gamma / jnp.sqrt(var + eps)
    shift = beta - mean * s_bn
    w_eff = w_hwio * s_bn[None, None, None, :]
    x_fold = jnp.transpose(x_seq, (0, 1, 3, 4, 2)).reshape(B, T, H, W * Cin)

    # (1) conv+BN (LIF epilogue disabled) vs full-precision lax reference.
    y_conv_fold = conv3x3_bn_lif_pallas(
        x_fold, w_eff, shift, H=H, W=W, Cin=Cin, Cout=Cout,
        vth=Vth, decay=decay, fuse_lif=False)
    y_conv = jnp.transpose(y_conv_fold.reshape(B, T, H, W, Cout),
                           (0, 1, 4, 2, 3))
    w_oihw = jnp.transpose(w_eff, (3, 2, 0, 1))
    c_ref = lax.conv_general_dilated(
        x_seq.reshape(B * T, Cin, H, W), w_oihw, (1, 1), "SAME",
        dimension_numbers=("NCHW", "OIHW", "NCHW"),
        precision=lax.Precision.HIGHEST)
    c_ref = (c_ref + shift[None, :, None, None]).reshape(B, T, Cout, H, W)
    err_conv = float(jnp.max(jnp.abs(y_conv - c_ref)))
    assert jnp.allclose(y_conv, c_ref, atol=1e-3, rtol=1e-3), err_conv

    # (2) fused spikes vs a pure-JAX LIF recurrence driven by the kernel's own
    #     conv output; elements whose membrane passes within 1e-3 of Vth are
    #     excluded (and stay excluded) so ulp-level rounding can't flake the
    #     binary threshold.
    s_fold = conv3x3_bn_lif_pallas(
        x_fold, w_eff, shift, H=H, W=W, Cin=Cin, Cout=Cout,
        vth=Vth, decay=decay, fuse_lif=True)
    assert bool(jnp.all((s_fold == 0.0) | (s_fold == 1.0)))
    y_from_fold = jnp.transpose(s_fold.reshape(B, T, H, W, Cout),
                                (0, 1, 4, 2, 3))
    assert bool(jnp.array_equal(y, y_from_fold))

    mem = jnp.zeros((B, H, W * Cout), jnp.float32)
    alive = jnp.ones((B, H, W * Cout), dtype=bool)
    for t in range(T):
        mem = mem * decay + y_conv_fold[:, t]
        sp_ref = (mem > Vth).astype(jnp.float32)
        near = jnp.abs(mem - Vth) < 1e-3
        ok = (s_fold[:, t] == sp_ref) | near | jnp.logical_not(alive)
        assert bool(jnp.all(ok)), f"spike mismatch at t={t}"
        alive = alive & jnp.logical_not(near)
        mem = (1.0 - sp_ref) * mem

    print("KERNEL_OK")
</pallas_src>

<mosaic_0001>
module attributes {stable_mosaic.version = 11 : i64} {
  func.func @probe(%arg0: memref<8x128xf32, #tpu.memory_space<vmem>>, %arg1: memref<8x128xf32, #tpu.memory_space<vmem>>) attributes {dimension_semantics = [], scalar_prefetch = 0 : i64, scratch_operands = 0 : i64, tpu.core_type = #tpu.core_type<tc>} {
    %c0 = arith.constant 0 : index
    %c0_0 = arith.constant 0 : index
    %0 = vector.load %arg0[%c0, %c0_0] : memref<8x128xf32, #tpu.memory_space<vmem>>, vector<8x128xf32>
    %c1_i32 = arith.constant 1 : i32
    %1 = tpu.dynamic_rotate %0 by %c1_i32 dim 0 : vector<8x128xf32>, i32 -> vector<8x128xf32>
    %c0_1 = arith.constant 0 : index
    %c0_2 = arith.constant 0 : index
    %2 = vector.load %arg1[%c0_1, %c0_2] : memref<8x128xf32, #tpu.memory_space<vmem>>, vector<8x128xf32>
    tpu.vector_store %arg1[%c0_1, %c0_2], %1 {strides = array<i32>} : memref<8x128xf32, #tpu.memory_space<vmem>>, vector<8x128xf32>,
    return
  }
}

</mosaic_0001>

<bundles_post_ra>
// kernel: tpu_custom_call.1
= control target key start
LH: loop header
LB: loop body
LE: loop exit
PB: predicated region body
PF: predicated region fallthrough
CT: control target
= control target key end

     0   :  { %6 = vsyncpa [#allocation3], 0  ;;  %s125_s0 = inlined_call_operand.hbm [shape: f32[8,128], index: 0, kind: input, shape index: {}]   ;;  %s126_s1 = inlined_call_operand.hbm [shape: f32[8,128], index: 1, kind: output, shape index: {}]  }
   0x1   :  { %7 = vsyncpa [#allocation4], 0  ;;  %s89_s6 = smov [#allocation2]   ;;  %s41_s10 = scalar_lea.hbm %s125_s0, 128 }
   0x2   :  { %s14_s7 = sshll.u32 %s89_s6, 4  ;;  %p42_p0 = scmp.ne.s32.totalorder %s125_s0, %s41_s10  ;;  %s15_s7 = int_to_ptr.vmem [resolvable:$true] %s14_s7 }
   0x3   :  { %p45_p1 = scmp.lt.u32.totalorder %s41_s10, %s125_s0 }
   0x5   :  { %p47_p2 = pnand %p45_p1, %p42_p0 }
   0x7   :  { %50 = shalt.err (!%p47_p2)
}
   0x8   :  { %s51_s15 = scalar_lea.vmem %s15_s7, 128  ;;  %p56_p4 = scmp.lt.s32.totalorder %s15_s7, %s15_s7 }
   0x9   :  { %p52_p3 = scmp.ne.s32.totalorder %s15_s7, %s51_s15  ;;  %p57_p5 = scmp.lt.s32.totalorder %s51_s15, %s51_s15 }
   0xb   :  { %p58_p6 = por %p57_p5, %p56_p4 }
   0xd   :  { %p59_p7 = pnand %p58_p6, %p52_p3 }
   0xf   :  { %62 = shalt.err (!%p59_p7)
}
  0x10   :  { %17 = dma.hbm_to_vmem [thread:$0]  %s125_s0, 128, %s15_s7, [#allocation3]  }
  0x11   :  { %85 = dma.done.wait [#allocation3], 128  }
  0x12   :  { %86 = vsyncadd [#allocation3], 4294967168  ;;  %s90_s18 = smov [#allocation5]   ;;  %v21_v0 = vld [vmem:[#allocation2] sm:$0xff] }
  0x13   :  { %s30_s19 = sshll.u32 %s90_s18, 4  ;;  %v22_v1 = vrot.slane %v21_v0, 7  ;;  %s31_s19 = int_to_ptr.vmem [resolvable:$true] %s30_s19 }
  0x14   :  { %s63_s20 = scalar_lea.vmem %s31_s19, 128  ;;  %p68_p9 = scmp.lt.s32.totalorder %s31_s19, %s31_s19 }
  0x15   :  { %23 = vst [vmem:[#allocation5] sm:$0xff] %v22_v1  ;;  %p64_p8 = scmp.ne.s32.totalorder %s31_s19, %s63_s20  ;;  %p69_p10 = scmp.lt.s32.totalorder %s63_s20, %s63_s20 }
  0x17   :  { %p70_p11 = por %p69_p10, %p68_p9 }
  0x19   :  { %p71_p12 = pnand %p70_p11, %p64_p8 }
  0x1b   :  { %74 = shalt.err (!%p71_p12)
}
  0x1c   :  { %s75_s23 = scalar_lea.hbm %s126_s1, 128 }
  0x1d   :  { %p76_p13 = scmp.ne.s32.totalorder %s126_s1, %s75_s23  ;;  %p79_p0 = scmp.lt.u32.totalorder %s75_s23, %s126_s1 }
  0x1f   :  { %p81_p1 = pnand %p79_p0, %p76_p13 }
  0x21   :  { %84 = shalt.err (!%p81_p1)
}
  0x22   :  { %33 = dma.vmem_to_hbm [thread:$0]  %s31_s19, 128, %s126_s1, [#allocation4]  }
  0x23   :  { %87 = dma.done.wait [#allocation4], 128  }
  0x24   :  { %88 = vsyncadd [#allocation4], 4294967168 }
  0x25   :  { %37 = vsyncpa [#allocation3], 1 }
  0x26   :  { %38 = vsyncpa [#allocation4], 1 }

</bundles_post_ra>
